<compile_context>
chip_gen: v7x
topology: tpu7x:2x2x1
jax: 0.10.0
libtpu: 0.0.40
codegen_flags: <defaults>
</compile_context>

<pallas_src>
import functools
import math

import jax
import jax.numpy as jnp
from jax.experimental import pallas as pl
from jax.experimental.pallas import tpu as pltpu

_LANE = 128
_VMEM_TILE_BUDGET = 16 * 1024 * 1024   # working-set target (safe on v7x's 64 MiB VMEM)
_VMEM_LIMIT_BYTES = 32 * 1024 * 1024


def _round_up(x, m):
    return (x + m - 1) // m * m


def _pick_tile_h(Ho, Wo, Wp, K, Cg, Og_pad, itemsize, fold_kw):
    """Largest row tile whose (double-buffered) working set fits the budget."""
    tile_h = min(Ho, 64)
    while True:
        halo = tile_h + K - 1
        in_w = Wo * K * Cg if fold_kw else Wp * Cg
        use = (2 * halo * in_w * itemsize             # input halo tile  (x2 buffers)
               + 2 * tile_h * Wo * Og_pad * itemsize  # output tile      (x2 buffers)
               + 2 * K * K * Cg * Og_pad * itemsize   # weights          (x2 buffers)
               + tile_h * Wo * Og_pad * 4)            # f32 accumulator scratch
        if use <= _VMEM_TILE_BUDGET or tile_h <= 8:
            break
        tile_h = max(8, tile_h // 2)
    return max(1, min(tile_h, Ho))


# ----------------------------------------------------------------------------
# Pallas kernel
# ----------------------------------------------------------------------------
def _conv2d_kernel(x_ref, w_ref, o_ref, acc_ref, *, K, Cg, Wo, tile_h, fold_kw):
    # fold_kw=True : x_ref (1, tile_h+K-1, Wo, K*Cg)   kw taps pre-folded on lanes
    # fold_kw=False: x_ref (1, tile_h+K-1, Wp, Cg)
    # w_ref        : (1, K, K*Cg, Og_pad)              per-group, kw-folded weights
    # o_ref        : (1, tile_h, Wo, Og_pad)           lane-dense output tile
    # acc_ref      : (tile_h*Wo, Og_pad) f32           VMEM scratch accumulator
    if fold_kw:
        KCg = K * Cg
        for kh in range(K):
            # kh shift is a cheap leading-dim slice; contraction = K*Cg per matmul.
            lhs = x_ref[0, kh:kh + tile_h, :, :].reshape(tile_h * Wo, KCg)
            contrib = jnp.dot(lhs, w_ref[0, kh],
                              preferred_element_type=jnp.float32)
            if kh == 0:
                acc_ref[...] = contrib
            else:
                acc_ref[...] += contrib
    else:
        first = True
        for kh in range(K):
            for kw in range(K):
                lhs = x_ref[0, kh:kh + tile_h, kw:kw + Wo, :].reshape(
                    tile_h * Wo, Cg)
                rhs = w_ref[0, kh, kw * Cg:(kw + 1) * Cg, :]
                contrib = jnp.dot(lhs, rhs, preferred_element_type=jnp.float32)
                if first:
                    acc_ref[...] = contrib
                    first = False
                else:
                    acc_ref[...] += contrib
    o_ref[0] = acc_ref[...].reshape(tile_h, Wo, o_ref.shape[-1]).astype(o_ref.dtype)


# ----------------------------------------------------------------------------
# Wrapper: layout prep + pallas_call (public API matches F.conv2d / the module)
# ----------------------------------------------------------------------------
def convolution_forward(x_nchw, weight_oihw, groups=1, *, tile_h=None):
    """F.conv2d(x, w, stride=1, padding=(K-1)//2, groups=groups), NCHW/OIHW."""
    N, Cin, H, W = x_nchw.shape
    Cout, Cg, K, K2 = weight_oihw.shape
    assert K == K2, "square kernels only"
    assert Cin == Cg * groups and Cout % groups == 0
    Og = Cout // groups

    pad = (K - 1) // 2
    Ho = H + 2 * pad - (K - 1)          # matches F.conv2d, incl. even K
    Wo = W + 2 * pad - (K - 1)
    Wp = W + 2 * pad

    Og_pad = _round_up(Og, _LANE)       # lane-dense output channels per group
    Cout_pad = groups * Og_pad
    itemsize = jnp.dtype(x_nchw.dtype).itemsize
    fold_kw = Cg < _LANE                # fold taps only when the MXU would starve

    if tile_h is None:
        tile_h = _pick_tile_h(Ho, Wo, Wp, K, Cg, Og_pad, itemsize, fold_kw)
    tile_h = max(1, min(int(tile_h), Ho))
    R = pl.cdiv(Ho, tile_h)
    Ho_pad = R * tile_h
    halo = tile_h + K - 1

    # ---- wrapper-side layout prep (plain XLA ops on HBM) --------------------
    # TODO(synk): in a full model keep activations NHWC and pre-haloed per block
    # so the transpose / pad / halo-gather below is paid once per network.
    x_nhwc = jnp.transpose(x_nchw, (0, 2, 3, 1))
    rows_needed = Ho_pad + K - 1
    x_padded = jnp.pad(
        x_nhwc, ((0, 0), (pad, rows_needed - H - pad), (pad, pad), (0, 0)))

    # Overlapping row tiles with halo: (N, R, halo, Wp, Cin)
    row_idx = jnp.arange(R)[:, None] * tile_h + jnp.arange(halo)[None, :]
    x_tiles = x_padded[:, row_idx]
    # Split channels per group and move groups to the front: (G, N, R, halo, Wp, Cg)
    x_halo = jnp.transpose(
        x_tiles.reshape(N, R, halo, Wp, groups, Cg), (4, 0, 1, 2, 3, 5))

    if fold_kw:
        # Pre-fold the K kw-taps onto the channel (lane) axis: (..., Wo, K*Cg).
        x_in = jnp.concatenate(
            [x_halo[..., kw:kw + Wo, :] for kw in range(K)], axis=-1)
        x_in = x_in.reshape(groups * N * R, halo, Wo, K * Cg)
        in_block = (1, halo, Wo, K * Cg)
    else:
        x_in = x_halo.reshape(groups * N * R, halo, Wp, Cg)
        in_block = (1, halo, Wp, Cg)

    # Weights: OIHW -> (G, K, K*Cg, Og_pad), cast to x dtype (== weight.to(x.dtype)).
    w = weight_oihw.astype(x_nchw.dtype)
    w = w.reshape(groups, Og, Cg, K, K)
    w = jnp.transpose(w, (0, 3, 4, 2, 1))           # (g, kh, kw, cg, og)
    w = w.reshape(groups, K, K * Cg, Og)            # fold (kw, cg): idx = kw*Cg + cg
    w = jnp.pad(w, ((0, 0), (0, 0), (0, 0), (0, Og_pad - Og)))

    kernel = functools.partial(_conv2d_kernel, K=K, Cg=Cg, Wo=Wo,
                               tile_h=tile_h, fold_kw=fold_kw)

    flops = 2 * N * Ho * Wo * Cout * Cg * K * K
    bytes_accessed = itemsize * (
        N * Cin * H * W + Cout * Cg * K * K + N * Cout * Ho * Wo)

    out_pad = pl.pallas_call(
        kernel,
        out_shape=jax.ShapeDtypeStruct((N, Ho_pad, Wo, Cout_pad), x_nchw.dtype),
        grid=(N, groups, R),
        in_specs=[
            pl.BlockSpec(in_block,
                         lambda n, g, r: ((g * N + n) * R + r, 0, 0, 0)),
            pl.BlockSpec((1, K, K * Cg, Og_pad),
                         lambda n, g, r: (g, 0, 0, 0)),
        ],
        out_specs=pl.BlockSpec((1, tile_h, Wo, Og_pad),
                               lambda n, g, r: (n, r, 0, g)),
        scratch_shapes=[pltpu.VMEM((tile_h * Wo, Og_pad), jnp.float32)],
        compiler_params=pltpu.CompilerParams(
            dimension_semantics=("parallel", "parallel", "parallel"),
            vmem_limit_bytes=_VMEM_LIMIT_BYTES),
        cost_estimate=pl.CostEstimate(flops=flops, transcendentals=0,
                                      bytes_accessed=bytes_accessed),
    )(x_in, w)

    # Drop channel padding / row padding, back to NCHW.
    out = out_pad.reshape(N, Ho_pad, Wo, groups, Og_pad)[..., :Og]
    out = out.reshape(N, Ho_pad, Wo, Cout)[:, :Ho]
    return jnp.transpose(out, (0, 3, 1, 2))


# ----------------------------------------------------------------------------
# Deterministic MSR (R3GAN) weight initialization, matching MSRInitializer
# ----------------------------------------------------------------------------
def msr_init_weight(key, out_channels, in_channels, kernel_size,
                    groups=1, activation_gain=1.0, dtype=jnp.float32):
    cg = in_channels // groups
    fan_in = cg * kernel_size * kernel_size
    shape = (out_channels, cg, kernel_size, kernel_size)
    if activation_gain == 0 or fan_in == 0:
        return jnp.zeros(shape, dtype)
    std = activation_gain / math.sqrt(fan_in)
    return (std * jax.random.normal(key, shape, jnp.float32)).astype(dtype)


# ----------------------------------------------------------------------------
# Demo / smoke tests
# ----------------------------------------------------------------------------
if __name__ == "__main__":
    root = jax.random.PRNGKey(0)

    def reference(x, w, groups, K):
        p = (K - 1) // 2
        return jax.lax.conv_general_dilated(
            x, w, window_strides=(1, 1), padding=((p, p), (p, p)),
            dimension_numbers=("NCHW", "OIHW", "NCHW"),
            feature_group_count=groups,
            precision=jax.lax.Precision.HIGHEST)

    def run_case(idx, *, N, Cin, Cout, K, groups, H, W, dtype, tile_h, atol, rtol):
        k_x, k_w = jax.random.split(jax.random.fold_in(root, idx))
        x = jax.random.normal(k_x, (N, Cin, H, W), jnp.float32).astype(dtype)
        w = msr_init_weight(k_w, Cout, Cin, K, groups=groups).astype(dtype)
        out = jax.block_until_ready(
            convolution_forward(x, w, groups=groups, tile_h=tile_h))
        ref = reference(x.astype(jnp.float32), w.astype(jnp.float32), groups, K)
        p = (K - 1) // 2
        Ho, Wo = H + 2 * p - (K - 1), W + 2 * p - (K - 1)
        assert out.shape == (N, Cout, Ho, Wo), (out.shape, (N, Cout, Ho, Wo))
        diff = jnp.max(jnp.abs(out.astype(jnp.float32) - ref))
        assert jnp.allclose(out.astype(jnp.float32), ref, atol=atol, rtol=rtol), (
            f"case {idx}: max |diff| = {diff}")

    # 1) Module demo shape: Convolution(4, 8, 3), batch 2, row-tiled grid (R=2).
    run_case(1, N=2, Cin=4, Cout=8, K=3, groups=1, H=16, W=16,
             dtype=jnp.float32, tile_h=8, atol=1e-4, rtol=1e-4)
    # 2) Grouped conv + row tile that does not divide H (exercises tail padding).
    run_case(2, N=1, Cin=8, Cout=16, K=3, groups=2, H=16, W=16,
             dtype=jnp.float32, tile_h=6, atol=1e-4, rtol=1e-4)
    # 3) Wide channels -> per-tap MXU path (contraction = Cg = 128), auto tile_h.
    run_case(3, N=1, Cin=128, Cout=128, K=3, groups=1, H=16, W=16,
             dtype=jnp.float32, tile_h=None, atol=1e-3, rtol=1e-3)
    # 4) Even kernel size (output is (H-1, W-1), matching F.conv2d padding=(K-1)//2).
    run_case(4, N=1, Cin=4, Cout=4, K=4, groups=1, H=17, W=17,
             dtype=jnp.float32, tile_h=8, atol=1e-4, rtol=1e-4)
    # 5) bf16 activations/weights (bf16 MXU inputs, f32 accumulation).
    run_case(5, N=1, Cin=4, Cout=8, K=3, groups=1, H=16, W=16,
             dtype=jnp.bfloat16, tile_h=8, atol=5e-2, rtol=5e-2)

    print("KERNEL_OK")
</pallas_src>

<mosaic_0001>
module attributes {stable_mosaic.version = 11 : i64} {
  func.func @_conv2d_kernel(%arg0: i32, %arg1: i32, %arg2: i32, %arg3: memref<1x10x16x12xf32, #tpu.memory_space<vmem>>, %arg4: memref<1x3x12x128xf32, #tpu.memory_space<vmem>>, %arg5: memref<1x8x16x128xf32, #tpu.memory_space<vmem>>, %arg6: memref<128x128xf32, #tpu.memory_space<vmem>>) attributes {dimension_semantics = [#tpu.dimension_semantics<parallel>, #tpu.dimension_semantics<parallel>, #tpu.dimension_semantics<parallel>], iteration_bounds = array<i64: 2, 1, 2>, scalar_prefetch = 0 : i64, scratch_operands = 1 : i64, tpu.core_type = #tpu.core_type<tc>, window_params = [{transform_indices = @transform_0, window_bounds = array<i64: 1, 10, 16, 12>}, {transform_indices = @transform_1, window_bounds = array<i64: 1, 3, 12, 128>}, {transform_indices = @transform_2, window_bounds = array<i64: 1, 8, 16, 128>}]} {
    %c0 = arith.constant 0 : index
    %c0_0 = arith.constant 0 : index
    %c0_1 = arith.constant 0 : index
    %c0_2 = arith.constant 0 : index
    %0 = vector.load %arg3[%c0, %c0_0, %c0_1, %c0_2] : memref<1x10x16x12xf32, #tpu.memory_space<vmem>>, vector<1x8x16x12xf32>
    %1 = vector.shape_cast %0 : vector<1x8x16x12xf32> to vector<8x16x12xf32>
    %2 = vector.shape_cast %1 : vector<8x16x12xf32> to vector<128x12xf32>
    %c0_3 = arith.constant 0 : index
    %c0_4 = arith.constant 0 : index
    %c0_5 = arith.constant 0 : index
    %c0_6 = arith.constant 0 : index
    %3 = vector.load %arg4[%c0_3, %c0_4, %c0_5, %c0_6] : memref<1x3x12x128xf32, #tpu.memory_space<vmem>>, vector<1x1x12x128xf32>
    %4 = vector.shape_cast %3 : vector<1x1x12x128xf32> to vector<12x128xf32>
    %cst = arith.constant dense<0.000000e+00> : vector<128x128xf32>
    %5 = tpu.matmul %2, %4, %cst {dimension_numbers = #tpu.dot_dimension_numbers<[1], [0], [0], [1], [0, 0, 1, 1], [], []>} : vector<128x12xf32>, vector<12x128xf32>, vector<128x128xf32> -> vector<128x128xf32>
    %c0_7 = arith.constant 0 : index
    %c0_8 = arith.constant 0 : index
    %6 = vector.load %arg6[%c0_7, %c0_8] : memref<128x128xf32, #tpu.memory_space<vmem>>, vector<128x128xf32>
    tpu.vector_store %arg6[%c0_7, %c0_8], %5 {strides = array<i32>} : memref<128x128xf32, #tpu.memory_space<vmem>>, vector<128x128xf32>,
    %c0_9 = arith.constant 0 : index
    %c1 = arith.constant 1 : index
    %c0_10 = arith.constant 0 : index
    %c0_11 = arith.constant 0 : index
    %7 = vector.load %arg3[%c0_9, %c1, %c0_10, %c0_11] : memref<1x10x16x12xf32, #tpu.memory_space<vmem>>, vector<1x8x16x12xf32>
    %8 = vector.shape_cast %7 : vector<1x8x16x12xf32> to vector<8x16x12xf32>
    %9 = vector.shape_cast %8 : vector<8x16x12xf32> to vector<128x12xf32>
    %c0_12 = arith.constant 0 : index
    %c1_13 = arith.constant 1 : index
    %c0_14 = arith.constant 0 : index
    %c0_15 = arith.constant 0 : index
    %10 = vector.load %arg4[%c0_12, %c1_13, %c0_14, %c0_15] : memref<1x3x12x128xf32, #tpu.memory_space<vmem>>, vector<1x1x12x128xf32>
    %11 = vector.shape_cast %10 : vector<1x1x12x128xf32> to vector<12x128xf32>
    %cst_16 = arith.constant dense<0.000000e+00> : vector<128x128xf32>
    %12 = tpu.matmul %9, %11, %cst_16 {dimension_numbers = #tpu.dot_dimension_numbers<[1], [0], [0], [1], [0, 0, 1, 1], [], []>} : vector<128x12xf32>, vector<12x128xf32>, vector<128x128xf32> -> vector<128x128xf32>
    %c0_17 = arith.constant 0 : index
    %c0_18 = arith.constant 0 : index
    %13 = vector.load %arg6[%c0_17, %c0_18] : memref<128x128xf32, #tpu.memory_space<vmem>>, vector<128x128xf32>
    %14 = arith.addf %13, %12 : vector<128x128xf32>
    %c0_19 = arith.constant 0 : index
    %c0_20 = arith.constant 0 : index
    %15 = vector.load %arg6[%c0_19, %c0_20] : memref<128x128xf32, #tpu.memory_space<vmem>>, vector<128x128xf32>
    tpu.vector_store %arg6[%c0_19, %c0_20], %14 {strides = array<i32>} : memref<128x128xf32, #tpu.memory_space<vmem>>, vector<128x128xf32>,
    %c0_21 = arith.constant 0 : index
    %c2 = arith.constant 2 : index
    %c0_22 = arith.constant 0 : index
    %c0_23 = arith.constant 0 : index
    %16 = vector.load %arg3[%c0_21, %c2, %c0_22, %c0_23] : memref<1x10x16x12xf32, #tpu.memory_space<vmem>>, vector<1x8x16x12xf32>
    %17 = vector.shape_cast %16 : vector<1x8x16x12xf32> to vector<8x16x12xf32>
    %18 = vector.shape_cast %17 : vector<8x16x12xf32> to vector<128x12xf32>
    %c0_24 = arith.constant 0 : index
    %c2_25 = arith.constant 2 : index
    %c0_26 = arith.constant 0 : index
    %c0_27 = arith.constant 0 : index
    %19 = vector.load %arg4[%c0_24, %c2_25, %c0_26, %c0_27] : memref<1x3x12x128xf32, #tpu.memory_space<vmem>>, vector<1x1x12x128xf32>
    %20 = vector.shape_cast %19 : vector<1x1x12x128xf32> to vector<12x128xf32>
    %cst_28 = arith.constant dense<0.000000e+00> : vector<128x128xf32>
    %21 = tpu.matmul %18, %20, %cst_28 {dimension_numbers = #tpu.dot_dimension_numbers<[1], [0], [0], [1], [0, 0, 1, 1], [], []>} : vector<128x12xf32>, vector<12x128xf32>, vector<128x128xf32> -> vector<128x128xf32>
    %c0_29 = arith.constant 0 : index
    %c0_30 = arith.constant 0 : index
    %22 = vector.load %arg6[%c0_29, %c0_30] : memref<128x128xf32, #tpu.memory_space<vmem>>, vector<128x128xf32>
    %23 = arith.addf %22, %21 : vector<128x128xf32>
    %c0_31 = arith.constant 0 : index
    %c0_32 = arith.constant 0 : index
    %24 = vector.load %arg6[%c0_31, %c0_32] : memref<128x128xf32, #tpu.memory_space<vmem>>, vector<128x128xf32>
    tpu.vector_store %arg6[%c0_31, %c0_32], %23 {strides = array<i32>} : memref<128x128xf32, #tpu.memory_space<vmem>>, vector<128x128xf32>,
    %c0_33 = arith.constant 0 : index
    %c0_34 = arith.constant 0 : index
    %25 = vector.load %arg6[%c0_33, %c0_34] : memref<128x128xf32, #tpu.memory_space<vmem>>, vector<128x128xf32>
    %26 = vector.shape_cast %25 : vector<128x128xf32> to vector<8x16x128xf32>
    %c0_35 = arith.constant 0 : index
    %c0_36 = arith.constant 0 : index
    %c0_37 = arith.constant 0 : index
    %c0_38 = arith.constant 0 : index
    %27 = vector.load %arg5[%c0_35, %c0_36, %c0_37, %c0_38] : memref<1x8x16x128xf32, #tpu.memory_space<vmem>>, vector<1x8x16x128xf32>
    %28 = vector.shape_cast %27 : vector<1x8x16x128xf32> to vector<8x16x128xf32>
    %29 = vector.shape_cast %26 : vector<8x16x128xf32> to vector<1x8x16x128xf32>
    tpu.vector_store %arg5[%c0_35, %c0_36, %c0_37, %c0_38], %29 {strides = array<i32>} : memref<1x8x16x128xf32, #tpu.memory_space<vmem>>, vector<1x8x16x128xf32>,
    return
  }
  func.func @transform_0(%arg0: i32, %arg1: i32, %arg2: i32) -> (i32, i32, i32, i32) {
    %c2_i32 = arith.constant 2 : i32
    %0 = arith.muli %arg1, %c2_i32 : i32
    %1 = arith.addi %0, %arg0 : i32
    %c2_i32_0 = arith.constant 2 : i32
    %2 = arith.muli %1, %c2_i32_0 : i32
    %3 = arith.addi %2, %arg2 : i32
    %c0_i32 = arith.constant 0 : i32
    %c0_i32_1 = arith.constant 0 : i32
    %c0_i32_2 = arith.constant 0 : i32
    %c0_i32_3 = arith.constant 0 : i32
    return %3, %c0_i32, %c0_i32_1, %c0_i32_2 : i32, i32, i32, i32
  }
  func.func @transform_1(%arg0: i32, %arg1: i32, %arg2: i32) -> (i32, i32, i32, i32) {
    %c0_i32 = arith.constant 0 : i32
    %c0_i32_0 = arith.constant 0 : i32
    %c0_i32_1 = arith.constant 0 : i32
    %c0_i32_2 = arith.constant 0 : i32
    return %arg1, %c0_i32, %c0_i32_0, %c0_i32_1 : i32, i32, i32, i32
  }
  func.func @transform_2(%arg0: i32, %arg1: i32, %arg2: i32) -> (i32, i32, i32, i32) {
    %c0_i32 = arith.constant 0 : i32
    %c0_i32_0 = arith.constant 0 : i32
    return %arg0, %arg2, %c0_i32, %arg1 : i32, i32, i32, i32
  }
}

</mosaic_0001>

<bundles_post_ra>
// kernel: tpu_custom_call.1
= control target key start
LH: loop header
LB: loop body
LE: loop exit
PB: predicated region body
PF: predicated region fallthrough
CT: control target
= control target key end

     0   :  { %7 = vsyncpa [#allocation4], 0  ;;  %s1874_s0 = inlined_call_operand.vmem [shape: f32[4,10,16,12], index: 0, kind: input, shape index: {}]   ;;  %s1875_s1 = inlined_call_operand.vmem [shape: f32[1,3,12,128], index: 1, kind: input, shape index: {}]   ;;  %s1876_s2 = inlined_call_operand.hbm [shape: f32[2,16,16,128], index: 2, kind: output, shape index: {}]  }
   0x1   :  { %9 = vsyncpa [#allocation4 + $0x1], 0  ;;  %s1605_s9 = smov 0   ;;  %s1607_s10 = smov 0  }
   0x2   :  { %s1609_s11 = smov 0   ;;  %s1611_s12 = smov 0  }
   0x3   :  { %s1613_s13 = smov 0   ;;  %s1615_s14 = smov 0  }
   0x4   :  { %s1617_s15 = smov 0   ;;  %s1619_s16 = smov 0  }
   0x5 LB: > { %s1119_s17 = sadd.s32 4294967295, %s1584_s16   ;;  %s1120_s18 = sadd.s32 4294967294, %s1584_s16   ;;  %s1584_s16 = sphi %s1619_s16, %s15_s16   ;;  %s1580_s15 = sphi %s1617_s15, %s1887_s15   ;;  %s1576_s14 = sphi %s1615_s14, %s1886_s14   ;;  %s1572_s13 = sphi %s1613_s13, %s1885_s13   ;;  %s1568_s12 = sphi %s1611_s12, %s1884_s12   ;;  %s1564_s11 = sphi %s1609_s11, %s1883_s11   ;;  %s1560_s10 = sphi %s1607_s10, %s1882_s10   ;;  %s1556_s9 = sphi %s1605_s9, %s1881_s9  }
   0x6   : > { %s27_s19 = sadd.s32 1, %s1576_s14  ;;  %s34_s20 = sadd.s32 1, %s1580_s15 }
   0x7   : > { %p28_p0 = scmp.ge.s32.totalorder %s27_s19, 2  ;;  %p115_p1 = scmp.ne.s32.totalorder %s1564_s11, %s1560_s10 }
   0x8   : > { %p116_p2 = scmp.eq.s32.totalorder %s1119_s17, 3  ;;  %p121_p5 = scmp.ne.s32.totalorder %s1560_s10, %s1556_s9 }
   0x9   : > { %s1889_s19 = smov (%p28_p0, %s27_s19), 0  ;;  %s1891_s20 = smov (!%p28_p0, %s34_s20), %s1580_s15 }
   0xa   : > { %s99_s21 = ssub.s32 %s1576_s14, %s1889_s19  ;;  %p1656_p3 = por %p116_p2, %p115_p1 }
   0xb   : > { %p36_p4 = scmp.ge.s32.totalorder %s1891_s20, 2  ;;  %p122_p6 = scmp.eq.s32.totalorder %s1120_s18, 3 }
   0xc   : > { %p1126_p7 = scmp.ge.s32.totalorder %s1584_s16, 1  ;;  %p164_p9 = scmp.lt.s32.totalorder %s1584_s16, 5 }
   0xd   : > { %s1893_s20 = smov (%p36_p4, %s1891_s20), 0  ;;  %p1665_p8 = por %p122_p6, %p121_p5 }
   0xe   : > { %s98_s24 = ssub.s32 %s1580_s15, %s1893_s20  ;;  %s105_s25 = sadd.s32 1, %s1564_s11 }
   0xf   : > { %s100_s26 = sor.u32 %s99_s21, %s98_s24  ;;  %p165_p10 = pnand %p1126_p7, %p164_p9 }
  0x10   : > { %p103_p11 = scmp.eq.s32.totalorder %s100_s26, 0  ;;  %v230_v0 = vld [vmem:[%s1875_s1] sm:$0xff] (!%p165_p10)  ;;  %v231_v1 = vld [vmem:[%s1875_s1 + $0x8] sm:$0xf] (!%p165_p10)  ;;  %vm281_vm0 = vcmask (!%p165_p10), 1043456   ;;  %v1163_v2 = vld [vmem:[%s1875_s1 + $0x10] sm:$0xff] (!%p165_p10) }
  0x11   : > { %168 = sbr.rel (%p165_p10) target bundleno = 304 (0x130), region = 28  ;;  %v1363_v3 = vpack.c.bf16 (!%p165_p10), %v231_v1, %v230_v0  ;;  %vm1586_vm1 = vmmov (!%p165_p10), 1   ;;  %v1164_v5 = vld [vmem:[%s1875_s1 + $0x18] sm:$0xf] (!%p165_p10)  ;;  %s1128_s8 = sshll.u32 (!%p165_p10), %s1572_s13, 1  ;;  %v1198_v6 = vld [vmem:[%s1875_s1 + $0x20] sm:$0xff] (!%p165_p10) }
  0x12   : > { %s1674_s27 = scalar_select %p103_p11, %s1564_s11, %s105_s25  }
  0x13   : > { %vm1685_vm2 = vmpackc.low (!%p165_p10), %vm281_vm0, %vm1586_vm1  ;;  %v1369_v7 = vpack.c.bf16 (!%p165_p10), %v1164_v5, %v1163_v2  ;;  %s198_s21 = sadd.s32 (!%p165_p10), %s1568_s12, %s1128_s8  ;;  %v1199_v8 = vld [vmem:[%s1875_s1 + $0x28] sm:$0xf] (!%p165_p10)  ;;  %vm232_vm3 = vcmask (!%p165_p10), 97280   ;;  %s192_s3 = sand.u32 (!%p165_p10), 1, %s1560_s10  }
  0x14   : > { %1365 = vmatprep.subr.msk.bf16.mxu1 (!%p165_p10), %vm1685_vm2, %v1363_v3  ;;  %p199_p12 = scmp.lt.s32.totalorder (!%p165_p10), %s198_s21, 3  ;;  %v1375_v9 = vpack.c.bf16 (!%p165_p10), %v1199_v8, %v1198_v6  ;;  %s1127_s4 = sshll.u32 (!%p165_p10), %s192_s3, 7 }
  0x15   : > { %1371 = vmatprep.subr.msk.bf16.mxu0 (!%p165_p10), %vm1685_vm2, %v1369_v7  ;;  %1368 = vmatpush3.bf16.msk.msra.mxu1 (!%p165_p10), %vm1685_vm2, %v1363_v3  ;;  %s1792_s5 = scalar_lea.vmem (!%p165_p10), [#allocation3], %s1127_s4  ;;  %s1224_s6 = sshll.u32 (!%p165_p10), %s1568_s12, 4 }
  0x16   : > { %1374 = vmatpush3.bf16.msk.msra.mxu0 (!%p165_p10), %vm1685_vm2, %v1369_v7  ;;  %1381 = vmatprep.subr.msk.bf16.mxu1 (!%p165_p10), %vm1685_vm2, %v1369_v7  ;;  %s1220_s7 = sshll.u32 (!%p165_p10), %s1572_s13, 5  ;;  %s1024_s13 = sshll.u32 (!%p165_p10), %s1792_s5, 4  ;;  %s1816_s13 = int_to_ptr.vmem [resolvable:$true] %s1024_s13 }
  0x17   : > { %1377 = vmatprep.subr.msk.bf16.mxu0 (!%p165_p10), %vm1685_vm2, %v1375_v9  ;;  %s1021_s8 = sadd.s32 (!%p165_p10), %s1224_s6, %s1220_s7  ;;  %s1822_s24 = scalar_lea.sflag (!%p165_p10), [#allocation4], %s192_s3 }
  0x18   : > { %s1895_s21 = smov (!%p199_p12, %s198_s21), 3  ;;  %s1221_s12 = sshll.u32 %s1021_s8, 7 }
  0x19   : > { %s1415_s26 = smul.u32 160, %s1895_s21  ;;  %s1814_s21 = scalar_lea.hbm %s1876_s2, %s1221_s12 }
  0x1a   : > { %s1490_s25 = scalar_lea.vmem %s1816_s13, 2048 }
  0x1b   : > { %s1715_s30 = scalar_lea.vmem %s1874_s0, %s1415_s26  ;;  %p1491_p13 = scmp.ne.s32.totalorder %s1816_s13, %s1490_s25 }
  0x1c   : > { %v214_v10 = vld [vmem:[%s1715_s30] sm:$0xff]  ;;  %v1147_v11 = vld [vmem:[%s1715_s30 + $0x10] sm:$0xff]  ;;  %v215_v12 = vld [vmem:[%s1715_s30 + $0x8] sm:$0xff]  ;;  %s1587_s26 = smov [#allocation3]  }
  0x1d   : > { %1283 = vmatprep.mubr.msk.f32.mxu1 %vm232_vm3, %v214_v10  ;;  %1311 = vmatprep.mubr.msk.f32.mxu0 %vm232_vm3, %v1147_v11  ;;  %v1148_v13 = vld [vmem:[%s1715_s30 + $0x18] sm:$0xff]  ;;  %v1149_v14 = vld [vmem:[%s1715_s30 + $0x20] sm:$0xff]  ;;  %v1150_v15 = vld [vmem:[%s1715_s30 + $0x28] sm:$0xff]  ;;  %p1492_p0 = pnand %p1491_p13, %p1656_p3  ;;  %s1494_s28 = sshll.u32 %s1587_s26, 4  ;;  %s1495_s28 = int_to_ptr.vmem [resolvable:$false] %s1494_s28 }
  0x1e   : > { %1284 = vmatmul.mubr.msk.f32.vlgmr.msra.gmra.mrb[0].mxu1 %vm232_vm3, %v215_v12  ;;  %1312 = vmatmul.mubr.msk.f32.vlgmr.msra.gmra.mrb[0].mxu0 %vm232_vm3, %v1148_v13  ;;  %v1151_v16 = vld [vmem:[%s1715_s30 + $0x30] sm:$0xff]  ;;  %v1152_v17 = vld [vmem:[%s1715_s30 + $0x38] sm:$0xff]  ;;  %v1153_v18 = vld [vmem:[%s1715_s30 + $0x40] sm:$0xff]  ;;  %s1496_s29 = scalar_lea.vmem %s1495_s28, 4096  ;;  %p1497_p2 = scmp.lt.s32.totalorder %s1816_s13, %s1495_s28 }
  0x1f   : > { %1382 = vmatpush3.bf16.msk.msra.mxu1 %vm1685_vm2, %v1369_v7  ;;  %1380 = vmatpush3.bf16.msk.msra.mxu0 %vm1685_vm2, %v1375_v9  ;;  %v1154_v19 = vld [vmem:[%s1715_s30 + $0x48] sm:$0xff]  ;;  %v224_v20 = vld [vmem:[%s1715_s30 + $0x50] sm:$0xff]  ;;  %v225_v21 = vld [vmem:[%s1715_s30 + $0x58] sm:$0xff]  ;;  %p1493_p1 = pneg %p1492_p0  ;;  %p1498_p4 = scmp.lt.s32.totalorder %s1496_s29, %s1490_s25 }
  0x20   : > { %1286 = vmatprep.mubr.msk.f32.mxu1 %vm232_vm3, %v1147_v11  ;;  %1314 = vmatprep.mubr.msk.f32.mxu0 %vm232_vm3, %v1149_v14  ;;  %v226_v22 = vld [vmem:[%s1715_s30 + $0x60] sm:$0xff]  ;;  %v227_v23 = vld [vmem:[%s1715_s30 + $0x68] sm:$0xff]  ;;  %v228_v24 = vld [vmem:[%s1715_s30 + $0x70] sm:$0xff] }
  0x21   : > { %v229_v25 = vld [vmem:[%s1715_s30 + $0x78] sm:$0xff]  ;;  %v1194_v26 = vld [vmem:[%s1715_s30 + $0x80] sm:$0xff]  ;;  %v1195_v27 = vld [vmem:[%s1715_s30 + $0x88] sm:$0xff]  ;;  %p1499_p5 = por %p1498_p4, %p1497_p2 }
  0x22   : > { %1287 = vmatmul.mubr.msk.f32.gmra.mrb[2].mxu1 %vm232_vm3, %v1148_v13  ;;  %1315 = vmatmul.mubr.msk.f32.gmra.mrb[2].mxu0 %vm232_vm3, %v1150_v15  ;;  %v1196_v28 = vld [vmem:[%s1715_s30 + $0x90] sm:$0xff]  ;;  %v1197_v29 = vld [vmem:[%s1715_s30 + $0x98] sm:$0xff] }
  0x23   : > { %1289 = vmatprep.mubr.msk.f32.mxu1 %vm232_vm3, %v1149_v14  ;;  %1317 = vmatprep.mubr.msk.f32.mxu0 %vm232_vm3, %v1151_v16  ;;  %p1500_p6 = pnand %p1499_p5, %p1493_p1 }
  0x26   : > { %1290 = vmatmul.mubr.msk.f32.gmra.mrb[4].mxu1 %vm232_vm3, %v1150_v15  ;;  %1318 = vmatmul.mubr.msk.f32.gmra.mrb[4].mxu0 %vm232_vm3, %v1152_v17 }
  0x27   : > { %1292 = vmatprep.mubr.msk.f32.mxu1 %vm232_vm3, %v1151_v16  ;;  %1320 = vmatprep.mubr.msk.f32.mxu0 %vm232_vm3, %v1153_v18 }
  0x2a   : > { %1293 = vmatmul.mubr.msk.f32.gmra.mrb[6].mxu1 %vm232_vm3, %v1152_v17  ;;  %1321 = vmatmul.mubr.msk.f32.gmra.mrb[6].mxu0 %vm232_vm3, %v1154_v19 }
  0x2b   : > { %1295 = vmatprep.mubr.msk.f32.mxu1 %vm232_vm3, %v1153_v18  ;;  %1339 = vmatprep.mubr.msk.f32.mxu0 %vm232_vm3, %v1149_v14 }
  0x2e   : > { %1296 = vmatmul.mubr.msk.f32.gmra.mrb[8].mxu1 %vm232_vm3, %v1154_v19  ;;  %1340 = vmatmul.mubr.msk.f32.vlgmr.msra.gmra.mrb[0].mxu0 %vm232_vm3, %v1150_v15 }
  0x2f   : > { %1298 = vmatprep.mubr.msk.f32.mxu1 %vm232_vm3, %v224_v20  ;;  %1342 = vmatprep.mubr.msk.f32.mxu0 %vm232_vm3, %v1151_v16 }
  0x32   : > { %1299 = vmatmul.mubr.msk.f32.gmra.mrb[10].mxu1 %vm232_vm3, %v225_v21  ;;  %1343 = vmatmul.mubr.msk.f32.gmra.mrb[2].mxu0 %vm232_vm3, %v1152_v17 }
  0x33   : > { %1301 = vmatprep.mubr.msk.f32.mxu1 %vm232_vm3, %v226_v22  ;;  %1345 = vmatprep.mubr.msk.f32.mxu0 %vm232_vm3, %v1153_v18 }
  0x36   : > { %1302 = vmatmul.mubr.msk.f32.gmra.mrb[12].mxu1 %vm232_vm3, %v227_v23  ;;  %1346 = vmatmul.mubr.msk.f32.gmra.mrb[4].mxu0 %vm232_vm3, %v1154_v19 }
  0x37   : > { %1304 = vmatprep.mubr.msk.f32.mxu1 %vm232_vm3, %v228_v24  ;;  %1348 = vmatprep.mubr.msk.f32.mxu0 %vm232_vm3, %v224_v20 }
  0x3a   : > { %1305 = vmatmul.mubr.msk.f32.gmra.mrb[14].mxu1 %vm232_vm3, %v229_v25  ;;  %1349 = vmatmul.mubr.msk.f32.gmra.mrb[6].mxu0 %vm232_vm3, %v225_v21 }
  0x3b   : > { %1323 = vmatprep.mubr.msk.f32.mxu1 %vm232_vm3, %v224_v20  ;;  %1351 = vmatprep.mubr.msk.f32.mxu0 %vm232_vm3, %v226_v22 }
  0x3e   : > { %1324 = vmatmul.mubr.msk.f32.vlgmr.msra.gmra.mrb[8].mxu1 %vm232_vm3, %v225_v21  ;;  %1352 = vmatmul.mubr.msk.f32.gmra.mrb[8].mxu0 %vm232_vm3, %v227_v23 }
  0x3f   : > { %1326 = vmatprep.mubr.msk.f32.mxu1 %vm232_vm3, %v226_v22  ;;  %1354 = vmatprep.mubr.msk.f32.mxu0 %vm232_vm3, %v228_v24 }
  0x42   : > { %1327 = vmatmul.mubr.msk.f32.gmra.mrb[10].mxu1 %vm232_vm3, %v227_v23  ;;  %1355 = vmatmul.mubr.msk.f32.gmra.mrb[10].mxu0 %vm232_vm3, %v229_v25 }
  0x43   : > { %1329 = vmatprep.mubr.msk.f32.mxu1 %vm232_vm3, %v228_v24  ;;  %1357 = vmatprep.mubr.msk.f32.mxu0 %vm232_vm3, %v1194_v26 }
  0x46   : > { %1330 = vmatmul.mubr.msk.f32.gmra.mrb[12].mxu1 %vm232_vm3, %v229_v25  ;;  %1358 = vmatmul.mubr.msk.f32.gmra.mrb[12].mxu0 %vm232_vm3, %v1195_v27 }
  0x47   : > { %1332 = vmatprep.mubr.msk.f32.mxu1 %vm232_vm3, %v1194_v26  ;;  %1360 = vmatprep.mubr.msk.f32.mxu0 %vm232_vm3, %v1196_v28 }
  0x4a   : > { %1333 = vmatmul.mubr.msk.f32.gmra.mrb[14].mxu1 %vm232_vm3, %v1195_v27  ;;  %1361 = vmatmul.mubr.msk.f32.gmra.mrb[14].mxu0 %vm232_vm3, %v1197_v29 }
  0xf1   : > { %v1285_v30 = vpop.f32.mrb[0].mxu1 }
  0xf2   : > { %v351_v31 = vpop.f32.mrb[1].mxu1 }
  0xf5   : > { %v1288_v32 = vpop.f32.mrb[2].mxu1 }
  0xf6   : > { %v361_v33 = vpop.f32.mrb[3].mxu1 }
  0xf9   : > { %v1291_v34 = vpop.f32.mrb[4].mxu1 }
  0xfa   : > { %v371_v35 = vpop.f32.mrb[5].mxu1 }
  0xfd   : > { %v1294_v36 = vpop.f32.mrb[6].mxu1 }
  0xfe   : > { %v381_v37 = vpop.f32.mrb[7].mxu1 }
 0x101   : > { %v1341_v38 = vpop.f32.mrb[0].mxu0 }
 0x102   : > { %v1383_v39 = vadd.f32 %v1341_v38, %v1285_v30  ;;  %v847_v40 = vpop.f32.mrb[1].mxu0 }
 0x103   : > { %v1384_v41 = vadd.f32 %v847_v40, %v351_v31 }
 0x104   : > { %991 = vst [vmem:[%s1792_s5 + $0x8] sm:$0xff] %v1383_v39 }
 0x105   : > { %990 = vst [vmem:[%s1792_s5] sm:$0xff] %v1384_v41  ;;  %v1344_v42 = vpop.f32.mrb[2].mxu0 }
 0x106   : > { %v1385_v43 = vadd.f32 %v1344_v42, %v1288_v32  ;;  %v857_v44 = vpop.f32.mrb[3].mxu0 }
 0x107   : > { %v1386_v45 = vadd.f32 %v857_v44, %v361_v33 }
 0x108   : > { %993 = vst [vmem:[%s1792_s5 + $0x18] sm:$0xff] %v1385_v43 }
 0x109   : > { %992 = vst [vmem:[%s1792_s5 + $0x10] sm:$0xff] %v1386_v45  ;;  %v1347_v46 = vpop.f32.mrb[4].mxu0 }
 0x10a   : > { %v1387_v47 = vadd.f32 %v1347_v46, %v1291_v34  ;;  %v867_v48 = vpop.f32.mrb[5].mxu0 }
 0x10b   : > { %v1388_v49 = vadd.f32 %v867_v48, %v371_v35 }
 0x10c   : > { %995 = vst [vmem:[%s1792_s5 + $0x28] sm:$0xff] %v1387_v47 }
 0x10d   : > { %994 = vst [vmem:[%s1792_s5 + $0x20] sm:$0xff] %v1388_v49  ;;  %v1350_v50 = vpop.f32.mrb[6].mxu0 }
 0x10e   : > { %v1389_v51 = vadd.f32 %v1350_v50, %v1294_v36  ;;  %v877_v52 = vpop.f32.mrb[7].mxu0 }
 0x10f   : > { %v1390_v53 = vadd.f32 %v877_v52, %v381_v37 }
 0x110   : > { %997 = vst [vmem:[%s1792_s5 + $0x38] sm:$0xff] %v1389_v51 }
 0x111   : > { %996 = vst [vmem:[%s1792_s5 + $0x30] sm:$0xff] %v1390_v53  ;;  %v1325_v54 = vpop.f32.mrb[8].mxu1  ;;  %v1353_v55 = vpop.f32.mrb[8].mxu0 }
 0x112   : > { %v1391_v56 = vadd.f32 %v1353_v55, %v1325_v54  ;;  %v623_v57 = vpop.f32.mrb[9].mxu1  ;;  %v887_v58 = vpop.f32.mrb[9].mxu0 }
 0x113   : > { %v1392_v59 = vadd.f32 %v887_v58, %v623_v57 }
 0x114   : > { %999 = vst [vmem:[%s1792_s5 + $0x48] sm:$0xff] %v1391_v56 }
 0x115   : > { %998 = vst [vmem:[%s1792_s5 + $0x40] sm:$0xff] %v1392_v59  ;;  %v1328_v60 = vpop.f32.mrb[10].mxu1  ;;  %v1356_v61 = vpop.f32.mrb[10].mxu0 }
 0x116   : > { %v1393_v62 = vadd.f32 %v1356_v61, %v1328_v60  ;;  %v633_v63 = vpop.f32.mrb[11].mxu1  ;;  %v897_v0 = vpop.f32.mrb[11].mxu0 }
 0x117   : > { %v1394_v1 = vadd.f32 %v897_v0, %v633_v63 }
 0x118   : > { %1001 = vst [vmem:[%s1792_s5 + $0x58] sm:$0xff] %v1393_v62 }
 0x119   : > { %1000 = vst [vmem:[%s1792_s5 + $0x50] sm:$0xff] %v1394_v1  ;;  %v1331_v2 = vpop.f32.mrb[12].mxu1  ;;  %v1359_v3 = vpop.f32.mrb[12].mxu0 }
 0x11a   : > { %v1395_v4 = vadd.f32 %v1359_v3, %v1331_v2  ;;  %v643_v5 = vpop.f32.mrb[13].mxu1  ;;  %v907_v6 = vpop.f32.mrb[13].mxu0 }
 0x11b   : > { %v1396_v7 = vadd.f32 %v907_v6, %v643_v5 }
 0x11c   : > { %1003 = vst [vmem:[%s1792_s5 + $0x68] sm:$0xff] %v1395_v4 }
 0x11d   : > { %1002 = vst [vmem:[%s1792_s5 + $0x60] sm:$0xff] %v1396_v7  ;;  %v1334_v8 = vpop.f32.mrb[14].mxu1  ;;  %v1362_v9 = vpop.f32.mrb[14].mxu0 }
 0x11e   : > { %v1397_v10 = vadd.f32 %v1362_v9, %v1334_v8  ;;  %v653_v11 = vpop.f32.mrb[15].mxu1  ;;  %v917_v12 = vpop.f32.mrb[15].mxu0 }
 0x11f   : > { %v1398_v13 = vadd.f32 %v917_v12, %v653_v11 }
 0x120   : > { %1005 = vst [vmem:[%s1792_s5 + $0x78] sm:$0xff] %v1397_v10 }
 0x121   : > { %1004 = vst [vmem:[%s1792_s5 + $0x70] sm:$0xff] %v1398_v13 }
 0x122   : > { %1503 = shalt.err (!%p1500_p6)
}
 0x123   : > { %s1504_s30 = scalar_lea.hbm %s1814_s21, 2048  ;;  %s1508_s5 = scalar_lea.hbm %s1876_s2, 8192 }
 0x124   : > { %p1505_p7 = scmp.ne.s32.totalorder %s1814_s21, %s1504_s30  ;;  %p1509_p11 = scmp.lt.u32.totalorder %s1814_s21, %s1876_s2 }
 0x125   : > { %p1510_p12 = scmp.lt.u32.totalorder %s1508_s5, %s1504_s30  ;;  %p1512_p0 = scmp.lt.u32.totalorder %s1504_s30, %s1814_s21 }
 0x126   : > { %p1506_p9 = pnand %p1505_p7, %p1656_p3 }
 0x127   : > { %p1511_p13 = por %p1510_p12, %p1509_p11 }
 0x128   : > { %p1507_p10 = pneg %p1506_p9 }
 0x129   : > { %p1513_p1 = por %p1512_p0, %p1511_p13 }
 0x12b   : > { %p1514_p2 = pnand %p1513_p1, %p1507_p10 }
 0x12d   : > { %1517 = shalt.err (!%p1514_p2)
}
 0x12e   : > { %s1588_s8 = smov 128   ;;  %s1589_s12 = smov 8  }
 0x12f   : > { %1416 = dma.vmem_to_hbm [thread:$0]  (%p1656_p3), %s1816_s13, 2048, %s1814_s21, %s1822_s24, %s1588_s8, %s1588_s8, %s1589_s12  }
 0x130 PF: > { %p1422_p4 = scmp.ge.s32.totalorder %s1584_s16, 2  ;;  %s1039_s17 = sand.u32 1, %s1556_s9  }
 0x131   : > { %s1040_s18 = scalar_lea.sflag [#allocation4], %s1039_s17 }
 0x132   : > { %p1419_p5 = pnand %p1422_p4, %p1665_p8 }
 0x134   : > { %1551 = dma.done.wait (!%p1419_p5), %s1040_s18, 2048  }
 0x135   : > { %1553 = vsyncadd (!%p1419_p5), %s1040_s18, 4294965248  ;;  %s15_s16 = sadd.s32 1, %s1584_s16   ;;  %s1881_s9 = smov %s1560_s10 }
 0x136   : > { %p12_p6 = scmp.ge.s32.totalorder %s15_s16, 6   ;;  %s1882_s10 = smov %s1564_s11 }
 0x137   : > { %s1883_s11 = smov %s1674_s27  ;;  %s1884_s12 = smov %s1576_s14 }
 0x138   : > { %s1885_s13 = smov %s1580_s15  ;;  %s1886_s14 = smov %s1889_s19 }
 0x139   : > { %s1887_s15 = smov %s1893_s20  ;;  %14 = sbr.rel (!%p12_p6) target bundleno = 5 (0x5), region = 70 }
 0x140   :  { %1045 = vsyncpa [#allocation4], 1 }
 0x141   :  { %1047 = vsyncpa [#allocation4 + $0x1], 1 }

</bundles_post_ra>
